<compile_context>
chip_gen: v7x
topology: tpu7x:2x2x1
jax: 0.10.0
libtpu: 0.0.40
codegen_flags: <defaults>
</compile_context>

<pallas_src>
import functools
import math

import jax
import jax.numpy as jnp
import numpy as np
from jax import lax
from jax.experimental import pallas as pl
from jax.experimental.pallas import tpu as pltpu

_EPS = 1e-08


# ----------------------------- in-kernel helpers ----------------------------

def _gelu_tanh(x):
    # TODO(synk): PyTorch nn.GELU() default is erf-exact; tanh approximation is
    # used because erf is not reliably lowered by Mosaic (max abs diff ~1e-3).
    c = math.sqrt(2.0 / math.pi)
    return 0.5 * x * (1.0 + jnp.tanh(c * (x + 0.044715 * x * x * x)))


def _softplus(x):
    # matches F.softplus(beta=1, threshold=20).  No jnp.minimum: exp() of the
    # overflowed branch gives inf -> log(1+inf)=inf, discarded by the where.
    return jnp.where(x > 20.0, x, jnp.log(1.0 + jnp.exp(x)))


# ------------------------- kernel 1: hidden state ----------------------------

def hidden_kernel(sin_ref, xemb_ref, wt1_ref, bt1_ref, wt2v_ref,
                  wv0x_ref, bv0_ref, wv12_ref, bv12_ref, h_ref):
    f32, bf16 = jnp.float32, jnp.bfloat16
    # time branch: sinusoidal -> Linear -> GELU (wt2 already folded into wt2v)
    g = _gelu_tanh(jnp.dot(sin_ref[...], wt1_ref[...],
                           preferred_element_type=f32) + bt1_ref[...])
    # first vel_module Linear on concat([x_emb, t_emb]) == split-weight matmuls
    h0 = (jnp.dot(xemb_ref[...], wv0x_ref[...], preferred_element_type=f32)
          + jnp.dot(g.astype(bf16), wt2v_ref[...], preferred_element_type=f32)
          + bv0_ref[...])
    h0 = _gelu_tanh(h0)
    # wv1 / wv2 folded into one HxH matmul (no nonlinearity between them)
    h2 = (jnp.dot(h0.astype(bf16), wv12_ref[...], preferred_element_type=f32)
          + bv12_ref[...])
    h_ref[...] = _gelu_tanh(_gelu_tanh(h2)).astype(h_ref.dtype)


# ------------- kernel 2: final projection + velocity post-process ------------

def velocity_kernel(x_ref, h_ref, coeff_ref, wvf_ref, bvf_ref, out_ref, *,
                    num_tokens):
    f32, bf16 = jnp.float32, jnp.bfloat16
    V = num_tokens
    tb, tn = out_ref.shape
    L = x_ref.shape[1]
    j = pl.program_id(0)                       # column-tile index (outer axis)

    # ---- dominant matmul: [tb,H]x[H,tn] bf16 on the MXU, f32 accumulation
    logits = (jnp.dot(h_ref[...], wvf_ref[...], preferred_element_type=f32)
              + bvf_ref[...])
    rates = _softplus(logits)

    # ---- masks rebuilt in-kernel from x (no [B, L*V] mask slabs from HBM) ----
    # rep[l, c] = 1 iff global output column (j*tn + c) belongs to sequence pos l
    col_l = lax.broadcasted_iota(jnp.int32, (L, tn), 0)
    col_g = j * tn + lax.broadcasted_iota(jnp.int32, (L, tn), 1)
    rep = jnp.logical_and(col_g >= col_l * V, col_g < (col_l + 1) * V)
    # x_bcast[b, c] = x[b, l(c)]  (exact: rep is one-hot per column; bf16 is
    # exact for integer token ids <= 256, else fall back to f32)
    xdt = bf16 if V <= 256 else f32
    x_bcast = jnp.dot(x_ref[...].astype(xdt), rep.astype(xdt),
                      preferred_element_type=f32)                   # [tb, tn]

    v_idx = lax.broadcasted_iota(jnp.int32, (tb, tn), 1) & (V - 1)  # token id of col
    is_mask = x_bcast > (V - 1) - 0.5                               # x[b,l] == V-1
    diag = jnp.abs(x_bcast - v_idx.astype(f32)) < 0.5               # v == x[b,l]

    # The reference first writes -1/(1-t) into the mask column, but for mask
    # rows that column IS the diagonal (zeroed before the row sum and then set
    # to -sum), and for non-mask rows the whole row is zeroed — so that term
    # never reaches the output and is dropped here (also avoids inf as t -> 1).
    rates = jnp.where(jnp.logical_and(is_mask, jnp.logical_not(diag)), rates, 0.0)

    # ---- per-(b, l) sum over the V columns of each position ----
    if V >= 256:
        # large V: two MXU matmuls (segmented reduce + broadcast back) instead
        # of 2*log2(V) full-slab XLU rolls (v6e/v7x only have 2 XLUs).
        P = tn // V
        seg = (lax.broadcasted_iota(jnp.int32, (tn, P), 0) // V
               == lax.broadcasted_iota(jnp.int32, (tn, P), 1)).astype(f32)
        segT = (lax.broadcasted_iota(jnp.int32, (P, tn), 1) // V
                == lax.broadcasted_iota(jnp.int32, (P, tn), 0)).astype(f32)
        s = jnp.dot(jnp.dot(rates, seg, preferred_element_type=f32), segT,
                    preferred_element_type=f32)
    else:
        # hypercube all-reduce inside each aligned V-block via masked roll+add
        # (XLU slot — overlaps the MXU/VPU work).
        s = rates
        d = 1
        while d < V:
            fwd = pltpu.roll(s, tn - d, axis=1)      # value from column c + d
            bwd = pltpu.roll(s, d, axis=1)           # value from column c - d
            s = s + jnp.where((v_idx & d) == 0, fwd, bwd)
            d *= 2

    rates = jnp.where(diag, -s, rates)
    out_ref[...] = coeff_ref[...] * rates


# ------------------------------ wrapper / glue ------------------------------

class LinearNoiseSchedule:
    """noise_schedule(t) = t, diff(t) = 1 (deterministic synthetic schedule)."""

    def __call__(self, t):
        return t

    def diff(self, t):
        return jnp.ones_like(t)


def init_params(key, num_tokens, seq_length, hidden_dim, num_layers=3):
    assert num_layers == 3, "kernel is written for num_layers=3 (2 hidden Linears)"
    V, L, H = num_tokens, seq_length, hidden_dim
    ks = jax.random.split(key, 16)

    def w(k, shape, scale=0.1):
        return (scale * jax.random.normal(k, shape)).astype(jnp.float32)

    wv0 = w(ks[6], (L * H + H, H))           # first vel_module Linear (split below)
    params = {
        "token_emb": w(ks[0], (V, H)),
        "wt1": w(ks[1], (H, H)), "bt1": w(ks[2], (1, H), 0.01),
        "wt2": w(ks[3], (H, H)), "bt2": w(ks[4], (1, H), 0.01),
        "wv0x": wv0[: L * H], "wv0t": wv0[L * H:], "bv0": w(ks[7], (1, H), 0.01),
        "wv1": w(ks[8], (H, H)), "bv1": w(ks[9], (1, H), 0.01),
        "wv2": w(ks[10], (H, H)), "bv2": w(ks[11], (1, H), 0.01),
        "wvf": w(ks[12], (H, L * V)), "bvf": w(ks[13], (1, L * V), 0.01),
    }
    return params


def _sinusoidal_embedding(t, hidden_dim):
    half = hidden_dim // 2
    scale = math.log(10000.0) / (half - 1)
    freqs = jnp.exp(jnp.arange(half, dtype=jnp.float32) * -scale)
    ang = t.astype(jnp.float32)[:, None] * freqs[None, :]
    return jnp.concatenate([jnp.sin(ang), jnp.cos(ang)], axis=-1)   # [B, H]


def _vmem_budget_bytes():
    """Generation-aware VMEM budget: ~3/4 of physical VMEM, capped at 100 MiB
    (~96 MiB on v5e/v6e's 128 MiB, ~48 MiB on v7x's 64 MiB / unknown)."""
    try:
        phys = pltpu.get_tpu_info().vmem_capacity_bytes
    except Exception:
        phys = 64 * 1024 * 1024          # conservative (v7x per-core) fallback
    return min(int(phys) * 3 // 4, 100 * 1024 * 1024)


def _pick_col_tile(N, V, tb, H, L, budget_bytes, max_tile):
    """Largest divisor of N that is a multiple of lcm(128, V), <= max_tile, and
    whose double-buffered kernel-2 footprint fits the VMEM budget.  Raises (no
    silent tn=N fallback) if nothing legal fits."""
    step = (128 * V) // math.gcd(128, V)
    if N % step != 0:
        raise ValueError(
            f"seq_length*num_tokens={N} must be a multiple of lcm(128, V)={step}")

    def footprint(tn):
        # wvf(bf16) + bvf(f32) + out(f32) + h(bf16) + x/coeff(f32), all x2 buffers
        return 2 * (H * tn * 2 + tn * 4 + tb * tn * 4 + tb * H * 2
                    + tb * (L + 1) * 4)

    best = 0
    c = step
    limit = min(N, max(max_tile, step))   # always consider at least one tile
    while c <= limit:
        if N % c == 0 and footprint(c) <= int(budget_bytes * 0.85):
            best = c
        c += step
    if best == 0:
        raise ValueError(
            f"no legal column tile fits the VMEM budget ({budget_bytes} B): the "
            f"smallest tile ({step} cols) needs ~{footprint(step)} B")
    return best


def noise_scaled_velocity(params, x, t, *, num_tokens, seq_length, hidden_dim,
                          noise_schedule):
    B, L = x.shape
    V, H = num_tokens, hidden_dim
    N = L * V
    assert L == seq_length
    assert V >= 2 and (V & (V - 1)) == 0, "kernel assumes num_tokens is a power of 2"
    # TODO(synk): non-power-of-two num_tokens needs a different in-kernel segmented sum.
    assert N % 128 == 0, "seq_length * num_tokens must be a multiple of 128 lanes"
    f32, bf16 = jnp.float32, jnp.bfloat16

    # ---- generation-aware tiling: batch rows (tb) and output columns (tn) ----
    budget = _vmem_budget_bytes()
    max_tile = 2048 if budget >= 80 * 1024 * 1024 else 1024
    if B <= 256:
        B_pad = max(8, -(-B // 8) * 8)      # pad to f32 sublane multiple
        tb = B_pad
    else:
        tb = 256
        B_pad = -(-B // tb) * tb
    tn = _pick_col_tile(N, V, tb, H, L, budget, max_tile)
    nb, nj = B_pad // tb, N // tn

    # ---- pad batch ----
    pad = B_pad - B
    x_p = jnp.pad(x.astype(jnp.int32), ((0, pad), (0, 0)))
    t_p = jnp.pad(t.astype(f32), ((0, pad),))

    # ---- tiny host-side glue ----
    # TODO(synk): for large B*L*H the embedding gather should move in-kernel
    # (scalar-prefetch x + row-gather BlockSpec); here B*L*H is tiny.
    x_emb = params["token_emb"][x_p].reshape(B_pad, L * H).astype(bf16)   # [B_pad, L*H]
    sin_emb = _sinusoidal_embedding(t_p, H).astype(bf16)                  # [B_pad, H]
    x_f = x_p.astype(f32)                                                 # [B_pad, L]
    coeff_col = (noise_schedule.diff(t_p)
                 / (1.0 - noise_schedule(t_p) + _EPS)).astype(f32)[:, None]

    # ---- fold back-to-back Linears (no nonlinearity between them) ----
    wt2v = (params["wt2"] @ params["wv0t"]).astype(bf16)                  # wt2 folded into wv0t
    bv0p = (params["bt2"] @ params["wv0t"] + params["bv0"]).astype(f32)
    wv12 = (params["wv1"] @ params["wv2"]).astype(bf16)                   # wv1 @ wv2
    bv12 = (params["bv1"] @ params["wv2"] + params["bv2"]).astype(f32)

    wt1 = params["wt1"].astype(bf16)
    bt1 = params["bt1"].astype(f32)
    wv0x = params["wv0x"].astype(bf16)
    wvf = params["wvf"].astype(bf16)
    bvf = params["bvf"].astype(f32)

    # ---- kernel 1: per-example hidden state [B_pad, H] (bf16) ----
    # Weights use constant index maps (DMA'd once); with the projection split
    # out, kernel-1 VMEM is no longer contended with the wvf/out tiles.
    def k1_row(shp):
        return pl.BlockSpec((tb,) + shp[1:], lambda i: (i, 0))

    def k1_const(shp):
        return pl.BlockSpec(shp, lambda i: (0, 0))

    h = pl.pallas_call(
        hidden_kernel,
        grid_spec=pltpu.PrefetchScalarGridSpec(
            num_scalar_prefetch=0,
            grid=(nb,),
            in_specs=[k1_row(sin_emb.shape), k1_row(x_emb.shape),
                      k1_const(wt1.shape), k1_const(bt1.shape),
                      k1_const(wt2v.shape), k1_const(wv0x.shape),
                      k1_const(bv0p.shape), k1_const(wv12.shape),
                      k1_const(bv12.shape)],
            out_specs=pl.BlockSpec((tb, H), lambda i: (i, 0)),
        ),
        out_shape=jax.ShapeDtypeStruct((B_pad, H), bf16),
        compiler_params=pltpu.CompilerParams(
            dimension_semantics=("parallel",),
            vmem_limit_bytes=budget),
    )(sin_emb, x_emb, wt1, bt1, wt2v, wv0x, bv0p, wv12, bv12)

    # ---- kernel 2: projection + velocity post-processing ----
    # grid = (nj outer, nb inner): the wvf block index is constant across the
    # inner batch axis, so the dominant [H, L*V] weight stream is DMA'd exactly
    # once from HBM regardless of nb; both axes are fully parallel (megacore
    # can shard the column axis even when nb == 1).
    out = pl.pallas_call(
        functools.partial(velocity_kernel, num_tokens=V),
        grid_spec=pltpu.PrefetchScalarGridSpec(
            num_scalar_prefetch=0,
            grid=(nj, nb),
            in_specs=[
                pl.BlockSpec((tb, L), lambda j, i: (i, 0)),    # tokens (as f32)
                pl.BlockSpec((tb, H), lambda j, i: (i, 0)),    # hidden state (bf16)
                pl.BlockSpec((tb, 1), lambda j, i: (i, 0)),    # coeff
                pl.BlockSpec((H, tn), lambda j, i: (0, j)),    # wvf column block
                pl.BlockSpec((1, tn), lambda j, i: (0, j)),    # bvf column block
            ],
            out_specs=pl.BlockSpec((tb, tn), lambda j, i: (i, j)),
        ),
        out_shape=jax.ShapeDtypeStruct((B_pad, N), f32),
        compiler_params=pltpu.CompilerParams(
            dimension_semantics=("parallel", "parallel"),
            vmem_limit_bytes=budget),
    )(x_f, h, coeff_col, wvf, bvf)
    return out[:B].reshape(B, L, V)


# ----------------------- pure-JAX reference (sanity) ------------------------

def reference(params, x, t, *, num_tokens, seq_length, hidden_dim, noise_schedule):
    B, L = x.shape
    V, H = num_tokens, hidden_dim
    f32 = jnp.float32

    x_emb = params["token_emb"][x].reshape(B, L * H).astype(f32)
    h = _gelu_tanh(_sinusoidal_embedding(t, H) @ params["wt1"] + params["bt1"])
    t_emb = h @ params["wt2"] + params["bt2"]

    h = jnp.concatenate([x_emb, t_emb], axis=-1)
    w0 = jnp.concatenate([params["wv0x"], params["wv0t"]], axis=0)
    h = _gelu_tanh(h @ w0 + params["bv0"])
    h = h @ params["wv1"] + params["bv1"]
    h = h @ params["wv2"] + params["bv2"]
    h = _gelu_tanh(_gelu_tanh(h))
    logits = (h @ params["wvf"] + params["bvf"]).reshape(B, L, V)

    rates = jax.nn.softplus(logits)
    is_mask = (x == V - 1)
    rates = rates.at[:, :, V - 1].set((-1.0 / (1.0 - t))[:, None] * is_mask.astype(f32))
    rates = jnp.where(is_mask[..., None], rates, 0.0)
    diag = jax.nn.one_hot(x, V, dtype=jnp.bool_)
    rates = jnp.where(diag, 0.0, rates)
    rates = jnp.where(diag, -rates.sum(-1, keepdims=True), rates)

    coeff = noise_schedule.diff(t) / (1.0 - noise_schedule(t) + _EPS)
    return coeff[:, None, None] * rates


# --------------------------------- main -------------------------------------

if __name__ == "__main__":
    B, L, V, H = 2, 8, 16, 32   # batch, seq_length, num_tokens, hidden_dim

    key = jax.random.PRNGKey(0)
    k_par, k_x, k_t = jax.random.split(key, 3)

    params = init_params(k_par, num_tokens=V, seq_length=L, hidden_dim=H)
    x = jax.random.randint(k_x, (B, L), 0, V, dtype=jnp.int32)
    t = jax.random.uniform(k_t, (B,), minval=0.05, maxval=0.9, dtype=jnp.float32)

    schedule = LinearNoiseSchedule()

    out = noise_scaled_velocity(params, x, t, num_tokens=V, seq_length=L,
                                hidden_dim=H, noise_schedule=schedule)
    out = jax.block_until_ready(out)

    ref = reference(params, x, t, num_tokens=V, seq_length=L, hidden_dim=H,
                    noise_schedule=schedule)
    # tolerance covers bf16 weights/activations + tanh-GELU approximation
    np.testing.assert_allclose(np.asarray(out), np.asarray(ref), rtol=5e-2, atol=5e-2)

    assert out.shape == (B, L, V) and out.dtype == jnp.float32
    print("KERNEL_OK")
</pallas_src>

<mosaic_0001>
module attributes {stable_mosaic.version = 11 : i64} {
  func.func @hidden_kernel(%arg0: i32, %arg1: memref<8x32xbf16, #tpu.memory_space<vmem>>, %arg2: memref<8x256xbf16, #tpu.memory_space<vmem>>, %arg3: memref<32x32xbf16, #tpu.memory_space<vmem>>, %arg4: memref<1x32xf32, #tpu.memory_space<vmem>>, %arg5: memref<32x32xbf16, #tpu.memory_space<vmem>>, %arg6: memref<256x32xbf16, #tpu.memory_space<vmem>>, %arg7: memref<1x32xf32, #tpu.memory_space<vmem>>, %arg8: memref<32x32xbf16, #tpu.memory_space<vmem>>, %arg9: memref<1x32xf32, #tpu.memory_space<vmem>>, %arg10: memref<8x32xbf16, #tpu.memory_space<vmem>>) attributes {dimension_semantics = [#tpu.dimension_semantics<parallel>], iteration_bounds = array<i64: 1>, scalar_prefetch = 0 : i64, scratch_operands = 0 : i64, tpu.core_type = #tpu.core_type<tc>, window_params = [{transform_indices = @transform_0, window_bounds = array<i64: 8, 32>}, {transform_indices = @transform_1, window_bounds = array<i64: 8, 256>}, {pipeline_mode = #tpu.pipeline_mode<synchronous>, transform_indices = @transform_2, window_bounds = array<i64: 32, 32>}, {pipeline_mode = #tpu.pipeline_mode<synchronous>, transform_indices = @transform_3, window_bounds = array<i64: 1, 32>}, {pipeline_mode = #tpu.pipeline_mode<synchronous>, transform_indices = @transform_4, window_bounds = array<i64: 32, 32>}, {pipeline_mode = #tpu.pipeline_mode<synchronous>, transform_indices = @transform_5, window_bounds = array<i64: 256, 32>}, {pipeline_mode = #tpu.pipeline_mode<synchronous>, transform_indices = @transform_6, window_bounds = array<i64: 1, 32>}, {pipeline_mode = #tpu.pipeline_mode<synchronous>, transform_indices = @transform_7, window_bounds = array<i64: 32, 32>}, {pipeline_mode = #tpu.pipeline_mode<synchronous>, transform_indices = @transform_8, window_bounds = array<i64: 1, 32>}, {transform_indices = @transform_9, window_bounds = array<i64: 8, 32>}]} {
    %c0 = arith.constant 0 : index
    %c0_0 = arith.constant 0 : index
    %0 = vector.load %arg1[%c0, %c0_0] : memref<8x32xbf16, #tpu.memory_space<vmem>>, vector<8x32xbf16>
    %c0_1 = arith.constant 0 : index
    %c0_2 = arith.constant 0 : index
    %1 = vector.load %arg3[%c0_1, %c0_2] : memref<32x32xbf16, #tpu.memory_space<vmem>>, vector<32x32xbf16>
    %cst = arith.constant dense<0.000000e+00> : vector<8x32xf32>
    %2 = tpu.matmul %0, %1, %cst {dimension_numbers = #tpu.dot_dimension_numbers<[1], [0], [0], [1], [0, 0, 1, 1], [], []>} : vector<8x32xbf16>, vector<32x32xbf16>, vector<8x32xf32> -> vector<8x32xf32>
    %c0_3 = arith.constant 0 : index
    %c0_4 = arith.constant 0 : index
    %3 = vector.load %arg4[%c0_3, %c0_4] : memref<1x32xf32, #tpu.memory_space<vmem>>, vector<1x32xf32>
    %4 = vector.broadcast %3 : vector<1x32xf32> to vector<8x32xf32>
    %5 = arith.addf %2, %4 : vector<8x32xf32>
    %cst_5 = arith.constant 5.000000e-01 : f32
    %6 = vector.broadcast %cst_5 : f32 to vector<8x32xf32>
    %7 = arith.mulf %6, %5 : vector<8x32xf32>
    %cst_6 = arith.constant 4.471500e-02 : f32
    %8 = vector.broadcast %cst_6 : f32 to vector<8x32xf32>
    %9 = arith.mulf %8, %5 : vector<8x32xf32>
    %10 = arith.mulf %9, %5 : vector<8x32xf32>
    %11 = arith.mulf %10, %5 : vector<8x32xf32>
    %12 = arith.addf %5, %11 : vector<8x32xf32>
    %cst_7 = arith.constant 0.797884583 : f32
    %13 = vector.broadcast %cst_7 : f32 to vector<8x32xf32>
    %14 = arith.mulf %13, %12 : vector<8x32xf32>
    %15 = math.tanh %14 : vector<8x32xf32>
    %cst_8 = arith.constant 1.000000e+00 : f32
    %16 = vector.broadcast %cst_8 : f32 to vector<8x32xf32>
    %17 = arith.addf %16, %15 : vector<8x32xf32>
    %18 = arith.mulf %7, %17 : vector<8x32xf32>
    %c0_9 = arith.constant 0 : index
    %c0_10 = arith.constant 0 : index
    %19 = vector.load %arg2[%c0_9, %c0_10] : memref<8x256xbf16, #tpu.memory_space<vmem>>, vector<8x256xbf16>
    %c0_11 = arith.constant 0 : index
    %c0_12 = arith.constant 0 : index
    %20 = vector.load %arg6[%c0_11, %c0_12] : memref<256x32xbf16, #tpu.memory_space<vmem>>, vector<256x32xbf16>
    %cst_13 = arith.constant dense<0.000000e+00> : vector<8x32xf32>
    %21 = tpu.matmul %19, %20, %cst_13 {dimension_numbers = #tpu.dot_dimension_numbers<[1], [0], [0], [1], [0, 0, 1, 1], [], []>} : vector<8x256xbf16>, vector<256x32xbf16>, vector<8x32xf32> -> vector<8x32xf32>
    %22 = arith.truncf %18 : vector<8x32xf32> to vector<8x32xbf16>
    %c0_14 = arith.constant 0 : index
    %c0_15 = arith.constant 0 : index
    %23 = vector.load %arg5[%c0_14, %c0_15] : memref<32x32xbf16, #tpu.memory_space<vmem>>, vector<32x32xbf16>
    %cst_16 = arith.constant dense<0.000000e+00> : vector<8x32xf32>
    %24 = tpu.matmul %22, %23, %cst_16 {dimension_numbers = #tpu.dot_dimension_numbers<[1], [0], [0], [1], [0, 0, 1, 1], [], []>} : vector<8x32xbf16>, vector<32x32xbf16>, vector<8x32xf32> -> vector<8x32xf32>
    %25 = arith.addf %21, %24 : vector<8x32xf32>
    %c0_17 = arith.constant 0 : index
    %c0_18 = arith.constant 0 : index
    %26 = vector.load %arg7[%c0_17, %c0_18] : memref<1x32xf32, #tpu.memory_space<vmem>>, vector<1x32xf32>
    %27 = vector.broadcast %26 : vector<1x32xf32> to vector<8x32xf32>
    %28 = arith.addf %25, %27 : vector<8x32xf32>
    %cst_19 = arith.constant 5.000000e-01 : f32
    %29 = vector.broadcast %cst_19 : f32 to vector<8x32xf32>
    %30 = arith.mulf %29, %28 : vector<8x32xf32>
    %cst_20 = arith.constant 4.471500e-02 : f32
    %31 = vector.broadcast %cst_20 : f32 to vector<8x32xf32>
    %32 = arith.mulf %31, %28 : vector<8x32xf32>
    %33 = arith.mulf %32, %28 : vector<8x32xf32>
    %34 = arith.mulf %33, %28 : vector<8x32xf32>
    %35 = arith.addf %28, %34 : vector<8x32xf32>
    %cst_21 = arith.constant 0.797884583 : f32
    %36 = vector.broadcast %cst_21 : f32 to vector<8x32xf32>
    %37 = arith.mulf %36, %35 : vector<8x32xf32>
    %38 = math.tanh %37 : vector<8x32xf32>
    %cst_22 = arith.constant 1.000000e+00 : f32
    %39 = vector.broadcast %cst_22 : f32 to vector<8x32xf32>
    %40 = arith.addf %39, %38 : vector<8x32xf32>
    %41 = arith.mulf %30, %40 : vector<8x32xf32>
    %42 = arith.truncf %41 : vector<8x32xf32> to vector<8x32xbf16>
    %c0_23 = arith.constant 0 : index
    %c0_24 = arith.constant 0 : index
    %43 = vector.load %arg8[%c0_23, %c0_24] : memref<32x32xbf16, #tpu.memory_space<vmem>>, vector<32x32xbf16>
    %cst_25 = arith.constant dense<0.000000e+00> : vector<8x32xf32>
    %44 = tpu.matmul %42, %43, %cst_25 {dimension_numbers = #tpu.dot_dimension_numbers<[1], [0], [0], [1], [0, 0, 1, 1], [], []>} : vector<8x32xbf16>, vector<32x32xbf16>, vector<8x32xf32> -> vector<8x32xf32>
    %c0_26 = arith.constant 0 : index
    %c0_27 = arith.constant 0 : index
    %45 = vector.load %arg9[%c0_26, %c0_27] : memref<1x32xf32, #tpu.memory_space<vmem>>, vector<1x32xf32>
    %46 = vector.broadcast %45 : vector<1x32xf32> to vector<8x32xf32>
    %47 = arith.addf %44, %46 : vector<8x32xf32>
    %cst_28 = arith.constant 5.000000e-01 : f32
    %48 = vector.broadcast %cst_28 : f32 to vector<8x32xf32>
    %49 = arith.mulf %48, %47 : vector<8x32xf32>
    %cst_29 = arith.constant 4.471500e-02 : f32
    %50 = vector.broadcast %cst_29 : f32 to vector<8x32xf32>
    %51 = arith.mulf %50, %47 : vector<8x32xf32>
    %52 = arith.mulf %51, %47 : vector<8x32xf32>
    %53 = arith.mulf %52, %47 : vector<8x32xf32>
    %54 = arith.addf %47, %53 : vector<8x32xf32>
    %cst_30 = arith.constant 0.797884583 : f32
    %55 = vector.broadcast %cst_30 : f32 to vector<8x32xf32>
    %56 = arith.mulf %55, %54 : vector<8x32xf32>
    %57 = math.tanh %56 : vector<8x32xf32>
    %cst_31 = arith.constant 1.000000e+00 : f32
    %58 = vector.broadcast %cst_31 : f32 to vector<8x32xf32>
    %59 = arith.addf %58, %57 : vector<8x32xf32>
    %60 = arith.mulf %49, %59 : vector<8x32xf32>
    %cst_32 = arith.constant 5.000000e-01 : f32
    %61 = vector.broadcast %cst_32 : f32 to vector<8x32xf32>
    %62 = arith.mulf %61, %60 : vector<8x32xf32>
    %cst_33 = arith.constant 4.471500e-02 : f32
    %63 = vector.broadcast %cst_33 : f32 to vector<8x32xf32>
    %64 = arith.mulf %63, %60 : vector<8x32xf32>
    %65 = arith.mulf %64, %60 : vector<8x32xf32>
    %66 = arith.mulf %65, %60 : vector<8x32xf32>
    %67 = arith.addf %60, %66 : vector<8x32xf32>
    %cst_34 = arith.constant 0.797884583 : f32
    %68 = vector.broadcast %cst_34 : f32 to vector<8x32xf32>
    %69 = arith.mulf %68, %67 : vector<8x32xf32>
    %70 = math.tanh %69 : vector<8x32xf32>
    %cst_35 = arith.constant 1.000000e+00 : f32
    %71 = vector.broadcast %cst_35 : f32 to vector<8x32xf32>
    %72 = arith.addf %71, %70 : vector<8x32xf32>
    %73 = arith.mulf %62, %72 : vector<8x32xf32>
    %74 = arith.truncf %73 : vector<8x32xf32> to vector<8x32xbf16>
    %c0_36 = arith.constant 0 : index
    %c0_37 = arith.constant 0 : index
    %75 = vector.load %arg10[%c0_36, %c0_37] : memref<8x32xbf16, #tpu.memory_space<vmem>>, vector<8x32xbf16>
    tpu.vector_store %arg10[%c0_36, %c0_37], %74 {strides = array<i32>} : memref<8x32xbf16, #tpu.memory_space<vmem>>, vector<8x32xbf16>,
    return
  }
  func.func @transform_0(%arg0: i32) -> (i32, i32) {
    %c0_i32 = arith.constant 0 : i32
    %c0_i32_0 = arith.constant 0 : i32
    return %arg0, %c0_i32 : i32, i32
  }
  func.func @transform_1(%arg0: i32) -> (i32, i32) {
    %c0_i32 = arith.constant 0 : i32
    %c0_i32_0 = arith.constant 0 : i32
    return %arg0, %c0_i32 : i32, i32
  }
  func.func @transform_2(%arg0: i32) -> (i32, i32) {
    %c0_i32 = arith.constant 0 : i32
    %c0_i32_0 = arith.constant 0 : i32
    %c0_i32_1 = arith.constant 0 : i32
    return %c0_i32, %c0_i32_0 : i32, i32
  }
  func.func @transform_3(%arg0: i32) -> (i32, i32) {
    %c0_i32 = arith.constant 0 : i32
    %c0_i32_0 = arith.constant 0 : i32
    %c0_i32_1 = arith.constant 0 : i32
    return %c0_i32, %c0_i32_0 : i32, i32
  }
  func.func @transform_4(%arg0: i32) -> (i32, i32) {
    %c0_i32 = arith.constant 0 : i32
    %c0_i32_0 = arith.constant 0 : i32
    %c0_i32_1 = arith.constant 0 : i32
    return %c0_i32, %c0_i32_0 : i32, i32
  }
  func.func @transform_5(%arg0: i32) -> (i32, i32) {
    %c0_i32 = arith.constant 0 : i32
    %c0_i32_0 = arith.constant 0 : i32
    %c0_i32_1 = arith.constant 0 : i32
    return %c0_i32, %c0_i32_0 : i32, i32
  }
  func.func @transform_6(%arg0: i32) -> (i32, i32) {
    %c0_i32 = arith.constant 0 : i32
    %c0_i32_0 = arith.constant 0 : i32
    %c0_i32_1 = arith.constant 0 : i32
    return %c0_i32, %c0_i32_0 : i32, i32
  }
  func.func @transform_7(%arg0: i32) -> (i32, i32) {
    %c0_i32 = arith.constant 0 : i32
    %c0_i32_0 = arith.constant 0 : i32
    %c0_i32_1 = arith.constant 0 : i32
    return %c0_i32, %c0_i32_0 : i32, i32
  }
  func.func @transform_8(%arg0: i32) -> (i32, i32) {
    %c0_i32 = arith.constant 0 : i32
    %c0_i32_0 = arith.constant 0 : i32
    %c0_i32_1 = arith.constant 0 : i32
    return %c0_i32, %c0_i32_0 : i32, i32
  }
  func.func @transform_9(%arg0: i32) -> (i32, i32) {
    %c0_i32 = arith.constant 0 : i32
    %c0_i32_0 = arith.constant 0 : i32
    return %arg0, %c0_i32 : i32, i32
  }
}

</mosaic_0001>

<bundles_post_ra>
// kernel: tpu_custom_call.1
= control target key start
LH: loop header
LB: loop body
LE: loop exit
PB: predicated region body
PF: predicated region fallthrough
CT: control target
= control target key end

     0   :  { %v610_v1 = vmov 0.0   ;;  %vm611_vm0 = vmmov 0   ;;  %vm58_vm1 = vcmask 261120   ;;  %s771_s0 = inlined_call_operand.vmem [shape: bf16[8,32], index: 0, kind: input, shape index: {}]   ;;  %s772_s1 = inlined_call_operand.vmem [shape: bf16[8,256], index: 1, kind: input, shape index: {}]   ;;  %s773_s2 = inlined_call_operand.vmem [shape: bf16[32,32], index: 2, kind: input, shape index: {}]   ;;  %s774_s3 = inlined_call_operand.vmem [shape: f32[1,32], index: 3, kind: input, shape index: {}]   ;;  %s775_s4 = inlined_call_operand.vmem [shape: bf16[32,32], index: 4, kind: input, shape index: {}]   ;;  %s776_s5 = inlined_call_operand.vmem [shape: bf16[256,32], index: 5, kind: input, shape index: {}]   ;;  %s777_s6 = inlined_call_operand.vmem [shape: f32[1,32], index: 6, kind: input, shape index: {}]   ;;  %s778_s7 = inlined_call_operand.vmem [shape: bf16[32,32], index: 7, kind: input, shape index: {}]   ;;  %s779_s8 = inlined_call_operand.vmem [shape: f32[1,32], index: 8, kind: input, shape index: {}]   ;;  %s780_s9 = inlined_call_operand.hbm [shape: bf16[8,32], index: 9, kind: output, shape index: {}]  }
   0x1   :  { %v554_v0 = vld [vmem:[%s773_s2] sm:$0xff]   ;;  %527 = vmatprep.subr.bf16.mxu1 %v610_v1  ;;  %v555_v2 = vld [vmem:[%s773_s2 + $0x8] sm:$0xff]   ;;  %531 = vmatprep.mubr.msk.bf16.mxu1 %vm611_vm0, %v610_v1 }
   0x2   :  { %528 = vmatpush3.bf16.msra.mxu1 %v554_v0  ;;  %v556_v3 = vld [vmem:[%s776_s5 + $0x40] sm:$0xff]   ;;  %v558_v5 = vld [vmem:[%s776_s5 + $0x48] sm:$0xff]  }
   0x3   :  { %529 = vmatprep.subr.bf16.mxu1 %v610_v1  ;;  %502 = vmatprep.subr.bf16.mxu0 %v556_v3  ;;  %v557_v4 = vld [vmem:[%s776_s5] sm:$0xff]   ;;  %v559_v7 = vld [vmem:[%s776_s5 + $0x8] sm:$0xff]  }
   0x4   :  { %v34_v6 = vld [vmem:[%s771_s0] sm:$0xf]  ;;  %503 = vmatpush3.bf16.msra.mxu0 %v557_v4 }
   0x5   :  { %504 = vmatprep.subr.bf16.mxu0 %v558_v5 }
   0x6   :  { %530 = vmatpush3.bf16.msra.mxu1 %v555_v2 }
   0x7   :  { %535 = vmatprep.subr.bf16.mxu1 %v610_v1 }
   0x8   :  { %505 = vmatpush3.bf16.msra.mxu0 %v559_v7 }
   0x9   :  { %532 = vmatmul.mubr.msk.bf16.vlgmr.msra.gmra.mrb[0].mxu1 %vm58_vm1, %v34_v6 }
   0xa   :  { %539 = vmatprep.mubr.msk.bf16.mxu1 %vm611_vm0, %v610_v1 }
   0xb   :  { %14 = vsyncpa [#allocation3], 0  ;;  %v560_v8 = vld [vmem:[%s776_s5 + $0x50] sm:$0xff]   ;;  %v562_v10 = vld [vmem:[%s776_s5 + $0x58] sm:$0xff]   ;;  %vm450_vm2 = vcmask 257024  }
   0xc   :  { %v561_v9 = vld [vmem:[%s776_s5 + $0x10] sm:$0xff]   ;;  %506 = vmatprep.subr.bf16.mxu0 %v560_v8  ;;  %v563_v11 = vld [vmem:[%s776_s5 + $0x18] sm:$0xff]   ;;  %v564_v12 = vld [vmem:[%s776_s5 + $0x60] sm:$0xff]  }
   0xd   :  { %507 = vmatpush3.bf16.msra.mxu0 %v561_v9  ;;  %v565_v13 = vld [vmem:[%s776_s5 + $0x20] sm:$0xff]   ;;  %v566_v14 = vld [vmem:[%s776_s5 + $0x68] sm:$0xff]   ;;  %v568_v16 = vld [vmem:[%s776_s5 + $0x70] sm:$0xff]  }
   0xe   :  { %508 = vmatprep.subr.bf16.mxu0 %v562_v10  ;;  %v567_v15 = vld [vmem:[%s776_s5 + $0x28] sm:$0xff]   ;;  %v569_v17 = vld [vmem:[%s776_s5 + $0x30] sm:$0xff]   ;;  %v570_v18 = vld [vmem:[%s776_s5 + $0x78] sm:$0xff]  }
   0xf   :  { %v572_v19 = vld [vmem:[%s775_s4] sm:$0xff]   ;;  %v575_v22 = vld [vmem:[%s775_s4 + $0x8] sm:$0xff]   ;;  %v571_v23 = vld [vmem:[%s776_s5 + $0x38] sm:$0xff]  }
  0x10   :  { %v111_v20 = vld [vmem:[%s772_s1] sm:$0xff]  ;;  %536 = vmatpush3.bf16.msra.mxu1 %v572_v19  ;;  %v577_v47 = vld [vmem:[%s778_s7 + $0x8] sm:$0xff]  }
  0x11   :  { %509 = vmatpush3.bf16.msra.mxu0 %v563_v11  ;;  %v474_v21 = vcombine.high %v111_v20, %v111_v20  ;;  %537 = vmatprep.subr.bf16.mxu1 %v610_v1  ;;  %v473_v24 = vcombine.low %v111_v20, %v111_v20  ;;  %v466_v25 = vld [vmem:[%s774_s3] ss:$0 sm:$0xff] }
  0x12   :  { %510 = vmatprep.subr.bf16.mxu0 %v564_v12  ;;  %v576_v46 = vld [vmem:[%s778_s7] sm:$0xff]  }
  0x13   :  { %339 = vmatprep.mubr.bf16.mxu0 %v474_v21  ;;  %v491_v49 = vld [vmem:[%s777_s6] ss:$0 sm:$0xff] }
  0x14   :  { %538 = vmatpush3.bf16.msra.mxu1 %v575_v22 }
  0x15   :  { %511 = vmatpush3.bf16.msra.mxu0 %v565_v13  ;;  %543 = vmatprep.subr.bf16.mxu1 %v610_v1 }
  0x16   :  { %512 = vmatprep.subr.bf16.mxu0 %v566_v14 }
  0x19   :  { %513 = vmatpush3.bf16.msra.mxu0 %v567_v15 }
  0x1a   :  { %514 = vmatprep.subr.bf16.mxu0 %v568_v16 }
  0x1d   :  { %515 = vmatpush3.bf16.msra.mxu0 %v569_v17 }
  0x1e   :  { %516 = vmatprep.subr.bf16.mxu0 %v570_v18 }
  0x21   :  { %517 = vmatpush3.bf16.msra.mxu0 %v571_v23 }
  0x24   :  { %340 = vmatmul.mubr.bf16.vlgmr.msra.gmra.mrb[0].mxu0 %v473_v24 }
  0xdc   :  { %v96_v26 = vpop.f32.mrb[0].mxu1 }
  0xdd   :  { %v97_v27 = vadd.f32 %v466_v25, %v96_v26  ;;  %v533_v28 = vpop.f32.mrb[1].mxu1 }
  0xde   :  { %v99_v29 = vpop.f32.mrb[2].mxu1 }
  0xdf   :  { %v103_v30 = vmul.f32 0.044715, %v97_v27  ;;  %v534_v31 = vpop.f32.mrb[3].mxu1  ;;  %v102_v37 = vmul.f32 0.5, %v97_v27 }
  0xe1   :  { %v104_v32 = vmul.f32 %v103_v30, %v97_v27 }
  0xe3   :  { %v105_v33 = vmul.f32 %v104_v32, %v97_v27 }
  0xe5   :  { %v106_v34 = vadd.f32 %v105_v33, %v97_v27 }
  0xe7   :  { %v107_v35 = vmul.f32 0.7978846, %v106_v34 }
  0xe9   :  { %578 = vtanh.f32 %v107_v35 }
  0xf3   :  { %v579_v36 = vpop.eup %578 }
  0xf4   :  { %v109_v38 = vadd.f32 1.0, %v579_v36 }
  0xf6   :  { %v110_v39 = vmul.f32 %v109_v38, %v102_v37 }
  0xf7   :  { %v518_v41 = vpop.f32.mrb[0].mxu0 }
  0xf8   :  { %v144_v40 = vpack.c.bf16 %v110_v39, %v110_v39  ;;  %v519_v42 = vpop.f32.mrb[1].mxu0 }
  0xf9   :  { %v520_v43 = vadd.f32 %v519_v42, %v518_v41  ;;  %v521_v44 = vpop.f32.mrb[2].mxu0 }
  0xfa   :  { %540 = vmatmul.mubr.msk.bf16.vlgmr.msra.gmra.mrb[4].mxu1 %vm58_vm1, %v144_v40  ;;  %v522_v45 = vpop.f32.mrb[3].mxu0 }
  0xfb   :  { %547 = vmatprep.mubr.msk.bf16.mxu1 %vm611_vm0, %v610_v1  ;;  %544 = vmatpush3.bf16.msra.mxu1 %v576_v46 }
  0xfc   :  { %545 = vmatprep.subr.bf16.mxu1 %v610_v1  ;;  %v492_v1 = vld [vmem:[%s779_s8] ss:$0 sm:$0xff]  ;;  %s612_s8 = smov [#allocation2]  }
  0xfd   :  { %s458_s11 = sshll.u32 %s612_s8, 4  ;;  %s459_s11 = int_to_ptr.vmem [resolvable:$true] %s458_s11 }
  0xfe   :  { %s586_s12 = scalar_lea.vmem %s459_s11, 64  ;;  %p591_p1 = scmp.lt.s32.totalorder %s459_s11, %s459_s11 }
  0xff   :  { %546 = vmatpush3.bf16.msra.mxu1 %v577_v47  ;;  %p587_p0 = scmp.ne.s32.totalorder %s459_s11, %s586_s12  ;;  %p592_p2 = scmp.lt.s32.totalorder %s586_s12, %s586_s12 }
 0x101   :  { %p593_p3 = por %p592_p2, %p591_p1 }
 0x103   :  { %p594_p4 = pnand %p593_p3, %p587_p0 }
 0x1cd   :  { %v198_v48 = vpop.f32.mrb[4].mxu1 }
 0x1ce   :  { %v342_v50 = vadd.f32 %v520_v43, %v198_v48  ;;  %v541_v51 = vpop.f32.mrb[5].mxu1 }
 0x1cf   :  { %v201_v52 = vpop.f32.mrb[6].mxu1 }
 0x1d0   :  { %v354_v53 = vadd.f32 %v491_v49, %v342_v50  ;;  %v542_v54 = vpop.f32.mrb[7].mxu1 }
 0x1d2   :  { %v356_v55 = vmul.f32 0.044715, %v354_v53  ;;  %v355_v61 = vmul.f32 0.5, %v354_v53 }
 0x1d4   :  { %v357_v56 = vmul.f32 %v356_v55, %v354_v53 }
 0x1d6   :  { %v358_v57 = vmul.f32 %v357_v56, %v354_v53 }
 0x1d8   :  { %v359_v58 = vadd.f32 %v358_v57, %v354_v53 }
 0x1da   :  { %v360_v59 = vmul.f32 0.7978846, %v359_v58 }
 0x1dc   :  { %580 = vtanh.f32 %v360_v59 }
 0x1e6   :  { %v581_v60 = vpop.eup %580 }
 0x1e7   :  { %v362_v62 = vadd.f32 1.0, %v581_v60 }
 0x1e9   :  { %v363_v63 = vmul.f32 %v362_v62, %v355_v61 }
 0x1eb   :  { %v364_v0 = vpack.c.bf16 %v363_v63, %v363_v63 }
 0x1ed   :  { %548 = vmatmul.mubr.msk.bf16.vlgmr.msra.gmra.mrb[8].mxu1 %vm58_vm1, %v364_v0 }
 0x2c0   :  { %v425_v2 = vpop.f32.mrb[8].mxu1 }
 0x2c1   :  { %v426_v3 = vadd.f32 %v492_v1, %v425_v2  ;;  %v549_v4 = vpop.f32.mrb[9].mxu1 }
 0x2c2   :  { %v428_v5 = vpop.f32.mrb[10].mxu1 }
 0x2c3   :  { %v432_v6 = vmul.f32 0.044715, %v426_v3  ;;  %v550_v7 = vpop.f32.mrb[11].mxu1  ;;  %v431_v13 = vmul.f32 0.5, %v426_v3 }
 0x2c5   :  { %v433_v8 = vmul.f32 %v432_v6, %v426_v3 }
 0x2c7   :  { %v434_v9 = vmul.f32 %v433_v8, %v426_v3 }
 0x2c9   :  { %v435_v10 = vadd.f32 %v434_v9, %v426_v3 }
 0x2cb   :  { %v436_v11 = vmul.f32 0.7978846, %v435_v10 }
 0x2cd   :  { %582 = vtanh.f32 %v436_v11 }
 0x2d7   :  { %v583_v12 = vpop.eup %582 }
 0x2d8   :  { %v438_v14 = vadd.f32 1.0, %v583_v12 }
 0x2da   :  { %v439_v15 = vmul.f32 %v438_v14, %v431_v13 }
 0x2dc   :  { %v441_v16 = vmul.f32 0.044715, %v439_v15  ;;  %v440_v22 = vmul.f32 0.5, %v439_v15 }
 0x2de   :  { %v442_v17 = vmul.f32 %v441_v16, %v439_v15 }
 0x2e0   :  { %v443_v18 = vmul.f32 %v442_v17, %v439_v15 }
 0x2e2   :  { %v444_v19 = vadd.f32 %v443_v18, %v439_v15 }
 0x2e4   :  { %v445_v20 = vmul.f32 0.7978846, %v444_v19 }
 0x2e6   :  { %584 = vtanh.f32 %v445_v20 }
 0x2f0   :  { %v585_v21 = vpop.eup %584 }
 0x2f1   :  { %v447_v23 = vadd.f32 1.0, %v585_v21 }
 0x2f3   :  { %v448_v24 = vmul.f32 %v447_v23, %v440_v22 }
 0x2f5   :  { %v449_v25 = vpack.c.bf16 %v448_v24, %v448_v24 }
 0x2f7   :  { %451 = vst.msk [vmem:[#allocation2] sm:$0xf] %vm450_vm2, %v449_v25 }
 0x2f8   :  { %597 = shalt.err (!%p594_p4)
}
 0x2f9   :  { %s598_s15 = scalar_lea.hbm %s780_s9, 64 }
 0x2fa   :  { %p599_p5 = scmp.ne.s32.totalorder %s780_s9, %s598_s15  ;;  %p602_p6 = scmp.lt.u32.totalorder %s598_s15, %s780_s9 }
 0x2fc   :  { %p604_p7 = pnand %p602_p6, %p599_p5 }
 0x2fe   :  { %607 = shalt.err (!%p604_p7)
}
 0x2ff   :  { %461 = dma.vmem_to_hbm [thread:$0]  %s459_s11, 64, %s780_s9, [#allocation3]  }
 0x300   :  { %608 = dma.done.wait [#allocation3], 64  }
 0x301   :  { %609 = vsyncadd [#allocation3], 4294967232 }
 0x302   :  { %465 = vsyncpa [#allocation3], 1 }

</bundles_post_ra>
